<compile_context>
chip_gen: v7x
topology: tpu7x:2x2x1
jax: 0.10.0
libtpu: 0.0.40
codegen_flags: <defaults>
</compile_context>

<pallas_src>
import functools

import numpy as np
import jax
import jax.numpy as jnp
from jax.experimental import pallas as pl
from jax.experimental.pallas import tpu as pltpu


# ----------------------------------------------------------------------------
# Pallas kernel: one batch image per grid step.
#   x_ref: (1, C, HW + 2*pad)  zero-padded flattened pixels
#   m_ref: (K, C, HW)          per-tap / per-pixel 0/1 mask (1 - zerofy)
#   w_ref: (K, Kn, C)          weights regrouped per tap
#   o_ref: (1, Kn, HW)
# ----------------------------------------------------------------------------
def _abc_fused_kernel(x_ref, m_ref, w_ref, o_ref, *, deltas, pad, hw):
    kn = o_ref.shape[1]
    acc = jnp.zeros((kn, hw), dtype=jnp.float32)
    for k, d in enumerate(deltas):          # K is small; static unroll
        start = pad + d                     # static python int in [0, 2*pad]
        xs = x_ref[0, :, pl.ds(start, hw)]  # (C, HW) shifted neighborhood read
        xm = xs * m_ref[k]                  # zerofy mask
        acc = acc + jnp.dot(w_ref[k], xm, preferred_element_type=jnp.float32)
    o_ref[0] = acc.astype(o_ref.dtype)


def abc_2d_large_forward(x, weights, mask_kcp, deltas, *, out_channel, max_batch):
    """x: (B,C,H,W); weights: (Kn, C*K); mask_kcp: (K, C, H*W); deltas: (K,) int."""
    B, C, H, W = x.shape
    if B > max_batch:
        raise ValueError("The batch size of input must be smaller than the "
                         "defined batch_size or default value")
    HW = H * W
    K = mask_kcp.shape[0]
    deltas = tuple(int(d) for d in np.asarray(deltas).reshape(-1))
    pad = max(abs(d) for d in deltas) if deltas else 0

    x_pad = jnp.pad(x.reshape(B, C, HW), ((0, 0), (0, 0), (pad, pad)))
    # weights column index is c*K + k  ->  (K, Kn, C) per-tap matrices.
    w_taps = jnp.transpose(weights.reshape(out_channel, C, K), (2, 0, 1))

    out = pl.pallas_call(
        functools.partial(_abc_fused_kernel, deltas=deltas, pad=pad, hw=HW),
        out_shape=jax.ShapeDtypeStruct((B, out_channel, HW), x.dtype),
        grid_spec=pltpu.PrefetchScalarGridSpec(
            num_scalar_prefetch=0,
            grid=(B,),
            in_specs=[
                pl.BlockSpec((1, C, HW + 2 * pad), lambda b: (b, 0, 0)),
                pl.BlockSpec((K, C, HW), lambda b: (0, 0, 0)),          # resident
                pl.BlockSpec((K, out_channel, C), lambda b: (0, 0, 0)),  # resident
            ],
            out_specs=pl.BlockSpec((1, out_channel, HW), lambda b: (b, 0, 0)),
        ),
        compiler_params=pltpu.CompilerParams(
            dimension_semantics=("parallel",)),
    )(x_pad, mask_kcp, w_taps)
    return out.reshape(B, out_channel, H, W)


# ----------------------------------------------------------------------------
# Host-side table construction (literal numpy replica of _build_hash)
# ----------------------------------------------------------------------------
def build_hash_tables(hashtable, in_channel, kernel_size, perceptual_size, batch_size):
    hashtable = np.asarray(hashtable)
    HC, HH, HW_, HHW = hashtable.shape
    KH, KW = kernel_size
    if in_channel % HC != 0:
        raise ValueError("in_channel must be divisible by hashtable dim 0")
    if HH * HW_ != HHW:
        raise ValueError("hash last dim must equal HH*HW")
    if HH < KH or HW_ < KW:
        raise ValueError("kernel_size must be smaller than hash-implied image size")
    if batch_size * in_channel * HHW >= 2 ** 31:
        raise ValueError("flat index range exceeds int32")

    KL = KH * KW
    chan_conv = np.zeros((HC, HH, HW_, KL), dtype=np.int64)
    chan_zero = np.ones((HC, HH, HW_, KL), dtype=np.float32)
    for c in range(HC):
        for h in range(HH):
            for w in range(HW_):
                n = 0
                pc = np.zeros((KH, KW), dtype=np.int64)
                pz = np.ones((KH, KW), dtype=np.float32)
                for i in hashtable[c, h, w, :]:
                    i = int(i)
                    if n < perceptual_size:
                        irh = i // HH - h
                        irw = i % HH - w
                        if abs(irh) <= (KH - 1) / 2 and abs(irw) <= (KW - 1) / 2:
                            pc[int(irh + (KH - 1) / 2), int(irw + (KW - 1) / 2)] = i
                            pz[int(irh + (KH - 1) / 2), int(irw + (KW - 1) / 2)] = 0
                            n += 1
                chan_conv[c, h, w] = pc.reshape(-1) + c * HH * HW_
                chan_zero[c, h, w] = pz.reshape(-1)

    reps = in_channel // HC
    batch_conv = np.concatenate([chan_conv + r * HC * HH * HW_ for r in range(reps)], axis=0)
    batch_zero = np.concatenate([chan_zero] * reps, axis=0)
    conv_hash = np.stack([batch_conv + b * in_channel * HH * HW_ for b in range(batch_size)], axis=0)
    zerofy_hash = np.stack([batch_zero] * batch_size, axis=0)
    return conv_hash, zerofy_hash


def build_fused_tables(conv_hash, zerofy_hash, in_channel, kernel_size, H, W):
    """Derive the per-tap mask (K,C,HW) and static pixel offsets used in-kernel."""
    KH, KW = kernel_size
    K = KH * KW
    HW = H * W
    C = in_channel
    deltas = np.array([(kh - (KH - 1) // 2) * W + (kw - (KW - 1) // 2)
                       for kh in range(KH) for kw in range(KW)], dtype=np.int64)
    mask_chwk = (zerofy_hash[0] == 0).astype(np.float32)           # (C,H,W,K)

    # Verify the static-offset equivalence relied upon by the fused kernel.
    pix = (np.arange(H)[:, None] * W + np.arange(W)[None, :]).reshape(1, H, W, 1)
    chan = (np.arange(C) * HW).reshape(C, 1, 1, 1)
    expected = chan + pix + deltas.reshape(1, 1, 1, K)
    sel = mask_chwk > 0
    if not np.array_equal(conv_hash[0][sel], expected[sel]):
        raise ValueError("hashtable not expressible as static window offsets; "
                         "fused kernel would be incorrect")

    mask_kcp = np.ascontiguousarray(
        np.transpose(mask_chwk.reshape(C, HW, K), (2, 0, 1)))      # (K,C,HW)
    return mask_kcp, deltas


# ----------------------------------------------------------------------------
# Pure-JAX reference following the PyTorch forward literally
# ----------------------------------------------------------------------------
def reference_forward(x, weights, conv_hash, zerofy_hash, out_channel):
    B, C, H, W = x.shape
    K = conv_hash.shape[-1]
    ch = conv_hash[:B]
    zh = zerofy_hash[:B]
    g = jnp.take(x.reshape(-1), ch)                     # (B,C,H,W,K) flat take
    g = jnp.where(zh == 1, jnp.zeros_like(g), g)        # zerofy
    x_cols = jnp.transpose(g, (1, 4, 0, 2, 3)).reshape(C * K, B * H * W)
    out = jnp.matmul(weights, x_cols)
    out = out.reshape(out_channel, B, H, W)
    return jnp.transpose(out, (1, 0, 2, 3))


# ----------------------------------------------------------------------------
# Main
# ----------------------------------------------------------------------------
if __name__ == "__main__":
    B, C, H, W = 2, 4, 16, 16
    KH, KW = 3, 3
    K = KH * KW
    OUT_CH = 8                     # out_channel
    HC = 2                         # hashtable channel groups (C % HC == 0)
    PERCEPTUAL = 5                 # perceptual_size (< K, so zerofy matters)
    MAX_BATCH = 4                  # module's batch_size argument
    HW = H * W

    # hashtable: (HC, H, W, H*W). First K entries per pixel are its 3x3 torus
    # neighbourhood (wrapped neighbours at image edges get zerofied by
    # _build_hash); remaining entries point at a far-away pixel so they never
    # fall inside the kernel window.
    hashtable = np.zeros((HC, H, W, HW), dtype=np.int64)
    offs = [(dh, dw) for dh in (-1, 0, 1) for dw in (-1, 0, 1)]
    for h in range(H):
        for w in range(W):
            neigh = [((h + dh) % H) * W + ((w + dw) % W) for dh, dw in offs]
            far = ((h + H // 2) % H) * W + ((w + W // 2) % W)
            for c in range(HC):
                hashtable[c, h, w, :K] = neigh
                hashtable[c, h, w, K:] = far

    conv_hash_np, zerofy_np = build_hash_tables(
        hashtable, C, (KH, KW), PERCEPTUAL, MAX_BATCH)
    mask_kcp_np, deltas = build_fused_tables(
        conv_hash_np, zerofy_np, C, (KH, KW), H, W)

    # Parameters (same init distribution as the PyTorch module).
    # NOTE: ABC_2D_Large defines `bias` but forward() never applies it,
    # so it is created for parity but intentionally unused.
    key = jax.random.PRNGKey(0)
    kx, kwt, kb = jax.random.split(key, 3)
    bound = float(np.sqrt(1.0 / C / PERCEPTUAL))
    weights = jax.random.uniform(kwt, (OUT_CH, C * K), jnp.float32, -bound, bound)
    _bias = jax.random.uniform(kb, (OUT_CH, 1), jnp.float32, -bound, bound)
    x = jax.random.normal(kx, (B, C, H, W), jnp.float32)

    mask_kcp = jnp.asarray(mask_kcp_np, dtype=jnp.float32)

    out = abc_2d_large_forward(
        x, weights, mask_kcp, deltas, out_channel=OUT_CH, max_batch=MAX_BATCH)
    out = jax.block_until_ready(out)

    conv_hash = jnp.asarray(conv_hash_np.astype(np.int32))
    zerofy = jnp.asarray(zerofy_np)
    ref = jax.block_until_ready(
        reference_forward(x, weights, conv_hash, zerofy, OUT_CH))

    assert out.shape == (B, OUT_CH, H, W), out.shape
    np.testing.assert_allclose(np.asarray(out), np.asarray(ref),
                               rtol=1e-4, atol=1e-4)
    print("KERNEL_OK")
</pallas_src>

<mosaic_0001>
module attributes {stable_mosaic.version = 11 : i64} {
  func.func @_abc_fused_kernel(%arg0: i32, %arg1: memref<1x4x290xf32, #tpu.memory_space<vmem>>, %arg2: memref<9x4x256xf32, #tpu.memory_space<vmem>>, %arg3: memref<9x8x4xf32, #tpu.memory_space<vmem>>, %arg4: memref<1x8x256xf32, #tpu.memory_space<vmem>>) attributes {dimension_semantics = [#tpu.dimension_semantics<parallel>], iteration_bounds = array<i64: 2>, scalar_prefetch = 0 : i64, scratch_operands = 0 : i64, tpu.core_type = #tpu.core_type<tc>, window_params = [{transform_indices = @transform_0, window_bounds = array<i64: 1, 4, 290>}, {pipeline_mode = #tpu.pipeline_mode<synchronous>, transform_indices = @transform_1, window_bounds = array<i64: 9, 4, 256>}, {pipeline_mode = #tpu.pipeline_mode<synchronous>, transform_indices = @transform_2, window_bounds = array<i64: 9, 8, 4>}, {transform_indices = @transform_3, window_bounds = array<i64: 1, 8, 256>}]} {
    %cst = arith.constant 0.000000e+00 : f32
    %0 = vector.broadcast %cst : f32 to vector<8x256xf32>
    %c0 = arith.constant 0 : index
    %c0_0 = arith.constant 0 : index
    %c0_1 = arith.constant 0 : index
    %1 = vector.load %arg1[%c0, %c0_0, %c0_1] : memref<1x4x290xf32, #tpu.memory_space<vmem>>, vector<1x4x256xf32>
    %2 = vector.shape_cast %1 : vector<1x4x256xf32> to vector<4x256xf32>
    %c0_2 = arith.constant 0 : index
    %c0_3 = arith.constant 0 : index
    %c0_4 = arith.constant 0 : index
    %3 = vector.load %arg2[%c0_2, %c0_3, %c0_4] : memref<9x4x256xf32, #tpu.memory_space<vmem>>, vector<1x4x256xf32>
    %4 = vector.shape_cast %3 : vector<1x4x256xf32> to vector<4x256xf32>
    %5 = arith.mulf %2, %4 : vector<4x256xf32>
    %c0_5 = arith.constant 0 : index
    %c0_6 = arith.constant 0 : index
    %c0_7 = arith.constant 0 : index
    %6 = vector.load %arg3[%c0_5, %c0_6, %c0_7] : memref<9x8x4xf32, #tpu.memory_space<vmem>>, vector<1x8x4xf32>
    %7 = vector.shape_cast %6 : vector<1x8x4xf32> to vector<8x4xf32>
    %cst_8 = arith.constant dense<0.000000e+00> : vector<8x256xf32>
    %8 = tpu.matmul %7, %5, %cst_8 {dimension_numbers = #tpu.dot_dimension_numbers<[1], [0], [0], [1], [0, 0, 1, 1], [], []>} : vector<8x4xf32>, vector<4x256xf32>, vector<8x256xf32> -> vector<8x256xf32>
    %9 = arith.addf %0, %8 : vector<8x256xf32>
    %c0_9 = arith.constant 0 : index
    %c0_10 = arith.constant 0 : index
    %c1 = arith.constant 1 : index
    %10 = vector.load %arg1[%c0_9, %c0_10, %c1] : memref<1x4x290xf32, #tpu.memory_space<vmem>>, vector<1x4x256xf32>
    %11 = vector.shape_cast %10 : vector<1x4x256xf32> to vector<4x256xf32>
    %c1_11 = arith.constant 1 : index
    %c0_12 = arith.constant 0 : index
    %c0_13 = arith.constant 0 : index
    %12 = vector.load %arg2[%c1_11, %c0_12, %c0_13] : memref<9x4x256xf32, #tpu.memory_space<vmem>>, vector<1x4x256xf32>
    %13 = vector.shape_cast %12 : vector<1x4x256xf32> to vector<4x256xf32>
    %14 = arith.mulf %11, %13 : vector<4x256xf32>
    %c1_14 = arith.constant 1 : index
    %c0_15 = arith.constant 0 : index
    %c0_16 = arith.constant 0 : index
    %15 = vector.load %arg3[%c1_14, %c0_15, %c0_16] : memref<9x8x4xf32, #tpu.memory_space<vmem>>, vector<1x8x4xf32>
    %16 = vector.shape_cast %15 : vector<1x8x4xf32> to vector<8x4xf32>
    %cst_17 = arith.constant dense<0.000000e+00> : vector<8x256xf32>
    %17 = tpu.matmul %16, %14, %cst_17 {dimension_numbers = #tpu.dot_dimension_numbers<[1], [0], [0], [1], [0, 0, 1, 1], [], []>} : vector<8x4xf32>, vector<4x256xf32>, vector<8x256xf32> -> vector<8x256xf32>
    %18 = arith.addf %9, %17 : vector<8x256xf32>
    %c0_18 = arith.constant 0 : index
    %c0_19 = arith.constant 0 : index
    %c2 = arith.constant 2 : index
    %19 = vector.load %arg1[%c0_18, %c0_19, %c2] : memref<1x4x290xf32, #tpu.memory_space<vmem>>, vector<1x4x256xf32>
    %20 = vector.shape_cast %19 : vector<1x4x256xf32> to vector<4x256xf32>
    %c2_20 = arith.constant 2 : index
    %c0_21 = arith.constant 0 : index
    %c0_22 = arith.constant 0 : index
    %21 = vector.load %arg2[%c2_20, %c0_21, %c0_22] : memref<9x4x256xf32, #tpu.memory_space<vmem>>, vector<1x4x256xf32>
    %22 = vector.shape_cast %21 : vector<1x4x256xf32> to vector<4x256xf32>
    %23 = arith.mulf %20, %22 : vector<4x256xf32>
    %c2_23 = arith.constant 2 : index
    %c0_24 = arith.constant 0 : index
    %c0_25 = arith.constant 0 : index
    %24 = vector.load %arg3[%c2_23, %c0_24, %c0_25] : memref<9x8x4xf32, #tpu.memory_space<vmem>>, vector<1x8x4xf32>
    %25 = vector.shape_cast %24 : vector<1x8x4xf32> to vector<8x4xf32>
    %cst_26 = arith.constant dense<0.000000e+00> : vector<8x256xf32>
    %26 = tpu.matmul %25, %23, %cst_26 {dimension_numbers = #tpu.dot_dimension_numbers<[1], [0], [0], [1], [0, 0, 1, 1], [], []>} : vector<8x4xf32>, vector<4x256xf32>, vector<8x256xf32> -> vector<8x256xf32>
    %27 = arith.addf %18, %26 : vector<8x256xf32>
    %c0_27 = arith.constant 0 : index
    %c0_28 = arith.constant 0 : index
    %c16 = arith.constant 16 : index
    %28 = vector.load %arg1[%c0_27, %c0_28, %c16] : memref<1x4x290xf32, #tpu.memory_space<vmem>>, vector<1x4x256xf32>
    %29 = vector.shape_cast %28 : vector<1x4x256xf32> to vector<4x256xf32>
    %c3 = arith.constant 3 : index
    %c0_29 = arith.constant 0 : index
    %c0_30 = arith.constant 0 : index
    %30 = vector.load %arg2[%c3, %c0_29, %c0_30] : memref<9x4x256xf32, #tpu.memory_space<vmem>>, vector<1x4x256xf32>
    %31 = vector.shape_cast %30 : vector<1x4x256xf32> to vector<4x256xf32>
    %32 = arith.mulf %29, %31 : vector<4x256xf32>
    %c3_31 = arith.constant 3 : index
    %c0_32 = arith.constant 0 : index
    %c0_33 = arith.constant 0 : index
    %33 = vector.load %arg3[%c3_31, %c0_32, %c0_33] : memref<9x8x4xf32, #tpu.memory_space<vmem>>, vector<1x8x4xf32>
    %34 = vector.shape_cast %33 : vector<1x8x4xf32> to vector<8x4xf32>
    %cst_34 = arith.constant dense<0.000000e+00> : vector<8x256xf32>
    %35 = tpu.matmul %34, %32, %cst_34 {dimension_numbers = #tpu.dot_dimension_numbers<[1], [0], [0], [1], [0, 0, 1, 1], [], []>} : vector<8x4xf32>, vector<4x256xf32>, vector<8x256xf32> -> vector<8x256xf32>
    %36 = arith.addf %27, %35 : vector<8x256xf32>
    %c0_35 = arith.constant 0 : index
    %c0_36 = arith.constant 0 : index
    %c17 = arith.constant 17 : index
    %37 = vector.load %arg1[%c0_35, %c0_36, %c17] : memref<1x4x290xf32, #tpu.memory_space<vmem>>, vector<1x4x256xf32>
    %38 = vector.shape_cast %37 : vector<1x4x256xf32> to vector<4x256xf32>
    %c4 = arith.constant 4 : index
    %c0_37 = arith.constant 0 : index
    %c0_38 = arith.constant 0 : index
    %39 = vector.load %arg2[%c4, %c0_37, %c0_38] : memref<9x4x256xf32, #tpu.memory_space<vmem>>, vector<1x4x256xf32>
    %40 = vector.shape_cast %39 : vector<1x4x256xf32> to vector<4x256xf32>
    %41 = arith.mulf %38, %40 : vector<4x256xf32>
    %c4_39 = arith.constant 4 : index
    %c0_40 = arith.constant 0 : index
    %c0_41 = arith.constant 0 : index
    %42 = vector.load %arg3[%c4_39, %c0_40, %c0_41] : memref<9x8x4xf32, #tpu.memory_space<vmem>>, vector<1x8x4xf32>
    %43 = vector.shape_cast %42 : vector<1x8x4xf32> to vector<8x4xf32>
    %cst_42 = arith.constant dense<0.000000e+00> : vector<8x256xf32>
    %44 = tpu.matmul %43, %41, %cst_42 {dimension_numbers = #tpu.dot_dimension_numbers<[1], [0], [0], [1], [0, 0, 1, 1], [], []>} : vector<8x4xf32>, vector<4x256xf32>, vector<8x256xf32> -> vector<8x256xf32>
    %45 = arith.addf %36, %44 : vector<8x256xf32>
    %c0_43 = arith.constant 0 : index
    %c0_44 = arith.constant 0 : index
    %c18 = arith.constant 18 : index
    %46 = vector.load %arg1[%c0_43, %c0_44, %c18] : memref<1x4x290xf32, #tpu.memory_space<vmem>>, vector<1x4x256xf32>
    %47 = vector.shape_cast %46 : vector<1x4x256xf32> to vector<4x256xf32>
    %c5 = arith.constant 5 : index
    %c0_45 = arith.constant 0 : index
    %c0_46 = arith.constant 0 : index
    %48 = vector.load %arg2[%c5, %c0_45, %c0_46] : memref<9x4x256xf32, #tpu.memory_space<vmem>>, vector<1x4x256xf32>
    %49 = vector.shape_cast %48 : vector<1x4x256xf32> to vector<4x256xf32>
    %50 = arith.mulf %47, %49 : vector<4x256xf32>
    %c5_47 = arith.constant 5 : index
    %c0_48 = arith.constant 0 : index
    %c0_49 = arith.constant 0 : index
    %51 = vector.load %arg3[%c5_47, %c0_48, %c0_49] : memref<9x8x4xf32, #tpu.memory_space<vmem>>, vector<1x8x4xf32>
    %52 = vector.shape_cast %51 : vector<1x8x4xf32> to vector<8x4xf32>
    %cst_50 = arith.constant dense<0.000000e+00> : vector<8x256xf32>
    %53 = tpu.matmul %52, %50, %cst_50 {dimension_numbers = #tpu.dot_dimension_numbers<[1], [0], [0], [1], [0, 0, 1, 1], [], []>} : vector<8x4xf32>, vector<4x256xf32>, vector<8x256xf32> -> vector<8x256xf32>
    %54 = arith.addf %45, %53 : vector<8x256xf32>
    %c0_51 = arith.constant 0 : index
    %c0_52 = arith.constant 0 : index
    %c32 = arith.constant 32 : index
    %55 = vector.load %arg1[%c0_51, %c0_52, %c32] : memref<1x4x290xf32, #tpu.memory_space<vmem>>, vector<1x4x256xf32>
    %56 = vector.shape_cast %55 : vector<1x4x256xf32> to vector<4x256xf32>
    %c6 = arith.constant 6 : index
    %c0_53 = arith.constant 0 : index
    %c0_54 = arith.constant 0 : index
    %57 = vector.load %arg2[%c6, %c0_53, %c0_54] : memref<9x4x256xf32, #tpu.memory_space<vmem>>, vector<1x4x256xf32>
    %58 = vector.shape_cast %57 : vector<1x4x256xf32> to vector<4x256xf32>
    %59 = arith.mulf %56, %58 : vector<4x256xf32>
    %c6_55 = arith.constant 6 : index
    %c0_56 = arith.constant 0 : index
    %c0_57 = arith.constant 0 : index
    %60 = vector.load %arg3[%c6_55, %c0_56, %c0_57] : memref<9x8x4xf32, #tpu.memory_space<vmem>>, vector<1x8x4xf32>
    %61 = vector.shape_cast %60 : vector<1x8x4xf32> to vector<8x4xf32>
    %cst_58 = arith.constant dense<0.000000e+00> : vector<8x256xf32>
    %62 = tpu.matmul %61, %59, %cst_58 {dimension_numbers = #tpu.dot_dimension_numbers<[1], [0], [0], [1], [0, 0, 1, 1], [], []>} : vector<8x4xf32>, vector<4x256xf32>, vector<8x256xf32> -> vector<8x256xf32>
    %63 = arith.addf %54, %62 : vector<8x256xf32>
    %c0_59 = arith.constant 0 : index
    %c0_60 = arith.constant 0 : index
    %c33 = arith.constant 33 : index
    %64 = vector.load %arg1[%c0_59, %c0_60, %c33] : memref<1x4x290xf32, #tpu.memory_space<vmem>>, vector<1x4x256xf32>
    %65 = vector.shape_cast %64 : vector<1x4x256xf32> to vector<4x256xf32>
    %c7 = arith.constant 7 : index
    %c0_61 = arith.constant 0 : index
    %c0_62 = arith.constant 0 : index
    %66 = vector.load %arg2[%c7, %c0_61, %c0_62] : memref<9x4x256xf32, #tpu.memory_space<vmem>>, vector<1x4x256xf32>
    %67 = vector.shape_cast %66 : vector<1x4x256xf32> to vector<4x256xf32>
    %68 = arith.mulf %65, %67 : vector<4x256xf32>
    %c7_63 = arith.constant 7 : index
    %c0_64 = arith.constant 0 : index
    %c0_65 = arith.constant 0 : index
    %69 = vector.load %arg3[%c7_63, %c0_64, %c0_65] : memref<9x8x4xf32, #tpu.memory_space<vmem>>, vector<1x8x4xf32>
    %70 = vector.shape_cast %69 : vector<1x8x4xf32> to vector<8x4xf32>
    %cst_66 = arith.constant dense<0.000000e+00> : vector<8x256xf32>
    %71 = tpu.matmul %70, %68, %cst_66 {dimension_numbers = #tpu.dot_dimension_numbers<[1], [0], [0], [1], [0, 0, 1, 1], [], []>} : vector<8x4xf32>, vector<4x256xf32>, vector<8x256xf32> -> vector<8x256xf32>
    %72 = arith.addf %63, %71 : vector<8x256xf32>
    %c0_67 = arith.constant 0 : index
    %c0_68 = arith.constant 0 : index
    %c34 = arith.constant 34 : index
    %73 = vector.load %arg1[%c0_67, %c0_68, %c34] : memref<1x4x290xf32, #tpu.memory_space<vmem>>, vector<1x4x256xf32>
    %74 = vector.shape_cast %73 : vector<1x4x256xf32> to vector<4x256xf32>
    %c8 = arith.constant 8 : index
    %c0_69 = arith.constant 0 : index
    %c0_70 = arith.constant 0 : index
    %75 = vector.load %arg2[%c8, %c0_69, %c0_70] : memref<9x4x256xf32, #tpu.memory_space<vmem>>, vector<1x4x256xf32>
    %76 = vector.shape_cast %75 : vector<1x4x256xf32> to vector<4x256xf32>
    %77 = arith.mulf %74, %76 : vector<4x256xf32>
    %c8_71 = arith.constant 8 : index
    %c0_72 = arith.constant 0 : index
    %c0_73 = arith.constant 0 : index
    %78 = vector.load %arg3[%c8_71, %c0_72, %c0_73] : memref<9x8x4xf32, #tpu.memory_space<vmem>>, vector<1x8x4xf32>
    %79 = vector.shape_cast %78 : vector<1x8x4xf32> to vector<8x4xf32>
    %cst_74 = arith.constant dense<0.000000e+00> : vector<8x256xf32>
    %80 = tpu.matmul %79, %77, %cst_74 {dimension_numbers = #tpu.dot_dimension_numbers<[1], [0], [0], [1], [0, 0, 1, 1], [], []>} : vector<8x4xf32>, vector<4x256xf32>, vector<8x256xf32> -> vector<8x256xf32>
    %81 = arith.addf %72, %80 : vector<8x256xf32>
    %c0_75 = arith.constant 0 : index
    %c0_76 = arith.constant 0 : index
    %c0_77 = arith.constant 0 : index
    %82 = vector.load %arg4[%c0_75, %c0_76, %c0_77] : memref<1x8x256xf32, #tpu.memory_space<vmem>>, vector<1x8x256xf32>
    %83 = vector.shape_cast %82 : vector<1x8x256xf32> to vector<8x256xf32>
    %84 = vector.shape_cast %81 : vector<8x256xf32> to vector<1x8x256xf32>
    tpu.vector_store %arg4[%c0_75, %c0_76, %c0_77], %84 {strides = array<i32>} : memref<1x8x256xf32, #tpu.memory_space<vmem>>, vector<1x8x256xf32>,
    return
  }
  func.func @transform_0(%arg0: i32) -> (i32, i32, i32) {
    %c0_i32 = arith.constant 0 : i32
    %c0_i32_0 = arith.constant 0 : i32
    %c0_i32_1 = arith.constant 0 : i32
    return %arg0, %c0_i32, %c0_i32_0 : i32, i32, i32
  }
  func.func @transform_1(%arg0: i32) -> (i32, i32, i32) {
    %c0_i32 = arith.constant 0 : i32
    %c0_i32_0 = arith.constant 0 : i32
    %c0_i32_1 = arith.constant 0 : i32
    %c0_i32_2 = arith.constant 0 : i32
    return %c0_i32, %c0_i32_0, %c0_i32_1 : i32, i32, i32
  }
  func.func @transform_2(%arg0: i32) -> (i32, i32, i32) {
    %c0_i32 = arith.constant 0 : i32
    %c0_i32_0 = arith.constant 0 : i32
    %c0_i32_1 = arith.constant 0 : i32
    %c0_i32_2 = arith.constant 0 : i32
    return %c0_i32, %c0_i32_0, %c0_i32_1 : i32, i32, i32
  }
  func.func @transform_3(%arg0: i32) -> (i32, i32, i32) {
    %c0_i32 = arith.constant 0 : i32
    %c0_i32_0 = arith.constant 0 : i32
    %c0_i32_1 = arith.constant 0 : i32
    return %arg0, %c0_i32, %c0_i32_0 : i32, i32, i32
  }
}

</mosaic_0001>

<bundles_post_ra>
// kernel: tpu_custom_call.1
= control target key start
LH: loop header
LB: loop body
LE: loop exit
PB: predicated region body
PF: predicated region fallthrough
CT: control target
= control target key end

     0   :  { %8 = vsyncpa [#allocation3], 0  ;;  %s1639_s0 = inlined_call_operand.vmem [shape: f32[2,4,290], index: 0, kind: input, shape index: {}]   ;;  %s1640_s1 = inlined_call_operand.vmem [shape: f32[9,4,256], index: 1, kind: input, shape index: {}]   ;;  %s1641_s2 = inlined_call_operand.vmem [shape: f32[9,8,4], index: 2, kind: input, shape index: {}]   ;;  %s1642_s3 = inlined_call_operand.hbm [shape: f32[2,8,256], index: 3, kind: output, shape index: {}]  }
   0x1   :  { %10 = vsyncpa [#allocation3 + $0x1], 0  ;;  %s1422_s12 = smov 0   ;;  %s1424_s13 = smov 0  }
   0x2   :  { %s1426_s14 = smov 0   ;;  %s1428_s15 = smov 0  }
   0x3 LB: > { %s1443_s16 = sadd.s32 4294967295, %s1382_s15   ;;  %s1192_s17 = sadd.s32 4294967294, %s1382_s15   ;;  %s1382_s15 = sphi %s1428_s15, %s1648_s15   ;;  %s1378_s14 = sphi %s1426_s14, %s1647_s14   ;;  %s1374_s13 = sphi %s1424_s13, %s1646_s13   ;;  %s1370_s12 = sphi %s1422_s12, %s1645_s12  }
   0x4   : > { %s1447_s18 = sadd.s32 1, %s1382_s15   ;;  %s91_s19 = sadd.s32 1, %s1378_s14 }
   0x5   : > { %s88_s20 = ssub.s32 %s1382_s15, %s1447_s18  ;;  %p101_p0 = scmp.ne.s32.totalorder %s1378_s14, %s1374_s13 }
   0x6   : > { %p89_p1 = scmp.eq.s32.totalorder %s88_s20, 0  ;;  %p102_p2 = scmp.eq.s32.totalorder %s1443_s16, 1 }
   0x7   : > { %p107_p3 = scmp.ne.s32.totalorder %s1374_s13, %s1370_s12  ;;  %p108_p4 = scmp.eq.s32.totalorder %s1192_s17, 1 }
   0x8   : > { %s1458_s21 = scalar_select %p89_p1, %s1378_s14, %s91_s19  }
   0x9   : > { %p1460_p5 = por %p102_p2, %p101_p0  ;;  %p1464_p6 = por %p108_p4, %p107_p3 }
   0xa   : > { %p1195_p7 = scmp.ge.s32.totalorder %s1382_s15, 1  ;;  %p140_p8 = scmp.lt.s32.totalorder %s1382_s15, 3 }
   0xc   : > { %p141_p9 = pnand %p1195_p7, %p140_p8 }
   0xd   : > { %v1216_v0 = vld [vmem:[%s1640_s1 + $0x20] sm:$0xff] (!%p141_p9)  ;;  %v1221_v1 = vld [vmem:[%s1640_s1 + $0x28] sm:$0xff] (!%p141_p9)  ;;  %s1384_s28 = smov (!%p141_p9), 17   ;;  %s1385_s29 = smov (!%p141_p9), 18   ;;  %v1226_v3 = vld [vmem:[%s1640_s1 + $0x30] sm:$0xff] (!%p141_p9)  ;;  %vm180_vm0 = vcmask (!%p141_p9), 7168  }
   0xe   : > { %144 = sbr.rel (%p141_p9) target bundleno = 527 (0x20f), region = 32  ;;  %581 = vrot.lane.b32.xlu0 (!%p141_p9), %v1216_v0, %s1384_s28  ;;  %689 = vrot.lane.b32.xlu1 (!%p141_p9), %v1221_v1, %s1385_s29  ;;  %v1198_v2 = vld [vmem:[%s1640_s1 + $0x8] sm:$0xff] (!%p141_p9)  ;;  %s1386_s7 = smov (!%p141_p9), 1   ;;  %v1206_v4 = vld [vmem:[%s1640_s1 + $0x10] sm:$0xff] (!%p141_p9)  ;;  %vm800_vm1 = vcmask (!%p141_p9), 261120   ;;  %vm584_vm2 = vcmask (!%p141_p9), 138240  }
   0xf   : > { %s1387_s8 = smov (!%p141_p9), 32   ;;  %v1231_v5 = vld [vmem:[%s1640_s1 + $0x38] sm:$0xff] (!%p141_p9)  ;;  %s1388_s19 = smov (!%p141_p9), 2   ;;  %v1236_v7 = vld [vmem:[%s1640_s1 + $0x40] sm:$0xff] (!%p141_p9)  ;;  %v1393_v18 = vmov (!%p141_p9), 0.0   ;;  %vm692_vm3 = vcmask (!%p141_p9), 146432  }
  0x10   : > { %s1389_s20 = smov (!%p141_p9), 33   ;;  %v1211_v6 = vld [vmem:[%s1640_s1 + $0x18] sm:$0xff] (!%p141_p9)  ;;  %s1390_s28 = smov (!%p141_p9), 16   ;;  %675 = vmatprep.mubr.f32.mxu0 (!%p141_p9), %v1393_v18  ;;  %273 = vmatprep.mubr.f32.mxu1 (!%p141_p9), %v1393_v18  ;;  %vm368_vm4 = vcmask (!%p141_p9), 15360   ;;  %vm908_vm5 = vcmask (!%p141_p9), 269312   ;;  %vm476_vm6 = vcmask (!%p141_p9), 130048  }
  0x11   : > { %s1391_s29 = smov (!%p141_p9), 34   ;;  %p164_p10 = scmp.lt.s32.totalorder (!%p141_p9), %s1443_s16, 1  ;;  %vm1016_vm7 = vcmask (!%p141_p9), 277504   ;;  %vm601_vm8 = vcmask (!%p141_p9), 908288   ;;  %vm204_vm9 = vcmask (!%p141_p9), 1043456   ;;  %vm197_vm10 = vcmask (!%p141_p9), 1039360  }
  0x12   : > { %177 = vrot.lane.b32.xlu0 (!%p141_p9), %v1198_v2, %s1386_s7  ;;  %797 = vrot.lane.b32.xlu1 (!%p141_p9), %v1226_v3, %s1387_s8  ;;  %s1392_s8 = smov (!%p141_p9), 111   ;;  %s1394_s9 = smov (!%p141_p9), 127   ;;  %vm200_vm11 = vcmask (!%p141_p9), 31744   ;;  %vm709_vm12 = vcmask (!%p141_p9), 900096   ;;  %vm817_vm13 = vcmask (!%p141_p9), 785408   ;;  %vm385_vm14 = vcmask (!%p141_p9), 1031168  }
  0x13   : > { %s1395_s10 = smov (!%p141_p9), 96   ;;  %s1396_s11 = smov (!%p141_p9), 110   ;;  %vm925_vm15 = vcmask (!%p141_p9), 777216  }
  0x14   : > { %s1397_s17 = smov (!%p141_p9), 126   ;;  %s1400_s24 = smov (!%p141_p9), 94  }
  0x15   : > { %s165_s30 = scalar_select %p164_p10, %s1443_s16, 1 }
  0x16   : > { %365 = vrot.lane.b32.xlu0 %v1206_v4, %s1388_s19  ;;  %905 = vrot.lane.b32.xlu1 %v1231_v5, %s1389_s20  ;;  %s1398_s19 = smov 95   ;;  %s1399_s20 = smov 112   ;;  %v170_v5 = vld [vmem:[%s1640_s1] sm:$0xff] }
  0x17   : > { %s1263_s4 = smul.u32 12, %s165_s30  ;;  %s161_s27 = sand.u32 1, %s1374_s13  }
  0x19   : > { %s1499_s7 = scalar_lea.vmem %s1639_s0, %s1263_s4 }
  0x1a   : > { %473 = vrot.lane.b32.xlu0 %v1211_v6, %s1390_s28  ;;  %1013 = vrot.lane.b32.xlu1 %v1236_v7, %s1391_s29  ;;  %v577_v9 = vld [vmem:[%s1499_s7 + $0x8] sm:$0xf]  ;;  %v1506_v19 = vld [vmem:[%s1499_s7] sm:$0xff]  ;;  %s1196_s28 = sshll.u32 %s161_s27, 4  ;;  %s1246_s29 = sshll.u32 %s1443_s16, 8 }
  0x1b   : > { %v173_v14 = vld [vmem:[%s1499_s7 + $0x8] sm:$0xf]  ;;  %s163_s30 = scalar_lea.vmem [#allocation2], %s1196_s28 }
  0x1c   : > { %v685_v31 = vld [vmem:[%s1499_s7 + $0x8] sm:$0xf]  ;;  %s1133_s4 = sshll.u32 %s163_s30, 4  ;;  %s1599_s4 = int_to_ptr.vmem [resolvable:$true] %s1133_s4 }
  0x1d   : > { %v361_v36 = vld [vmem:[%s1499_s7 + $0x8] sm:$0xf]  ;;  %s1320_s16 = scalar_lea.vmem %s1599_s4, 256 }
  0x1e   : > { %v793_v40 = vld [vmem:[%s1499_s7 + $0x8] sm:$0xf]  ;;  %p1321_p11 = scmp.ne.s32.totalorder %s1599_s4, %s1320_s16 }
  0x1f   : > { %v901_v43 = vld [vmem:[%s1499_s7 + $0x8] sm:$0xf] }
  0x20   : > { %v469_v53 = vld [vmem:[%s1499_s7 + $0x8] sm:$0xf]  ;;  %p1322_p12 = pnand %p1321_p11, %p1460_p5 }
  0x21   : > { %v1009_v59 = vld [vmem:[%s1499_s7 + $0x8] sm:$0xf]  ;;  %s1597_s7 = scalar_lea.hbm %s1642_s3, %s1246_s29 }
  0x22   : > { %p1323_p13 = pneg %p1322_p12 }
  0x80   : > { %v582_v8 = vpop.permute.xlu0 %581  ;;  %v690_v10 = vpop.permute.xlu1 %689 }
  0x81   : > { %v583_v11 = vrot.slane %v582_v8, 4  ;;  %v691_v25 = vrot.slane %v690_v10, 4 }
  0x83   : > { %v589_v12 = vmul.f32 %v583_v11, %v577_v9  ;;  %v585_v23 = vsel %vm584_vm2, %v583_v11, %v582_v8  ;;  %v693_v28 = vsel %vm692_vm3, %v691_v25, %v690_v10  ;;  %v697_v35 = vmul.f32 %v691_v25, %v685_v31  ;;  %v1222_v25 = vld [vmem:[%s1641_s2 + $0x28] sm:$0xff] }
  0x84   : > { %v178_v13 = vpop.permute.xlu0 %177  ;;  %v798_v15 = vpop.permute.xlu1 %797  ;;  %v588_v27 = vmul.f32 %v585_v23, %v1506_v19  ;;  %v696_v32 = vmul.f32 %v693_v28, %v1506_v19  ;;  %v171_v8 = vmul.f32 %v1506_v19, %v170_v5 }
  0x85   : > { %v179_v16 = vrot.slane %v178_v13, 4  ;;  %599 = vrot.lane.b32.xlu1 %v589_v12, %s1392_s8  ;;  %v799_v17 = vrot.slane %v798_v15, 4 }
  0x86   : > { %v594_v29 = vcombine.high %v588_v27, %v588_v27  ;;  %v702_v37 = vcombine.high %v696_v32, %v696_v32 }
  0x87   : > { %v181_v20 = vsel %vm180_vm0, %v179_v16, %v178_v13  ;;  %v185_v21 = vmul.f32 %v179_v16, %v173_v14  ;;  %v801_v22 = vsel %vm800_vm1, %v799_v17, %v798_v15  ;;  %v805_v42 = vmul.f32 %v799_v17, %v793_v40  ;;  %v1217_v13 = vld [vmem:[%s1641_s2 + $0x20] sm:$0xff]  ;;  %v1199_v17 = vld [vmem:[%s1641_s2 + $0x8] sm:$0xff] }
  0x88   : > { %v184_v24 = vmul.f32 %v1506_v19, %v181_v20  ;;  %v804_v26 = vmul.f32 %v801_v22, %v1506_v19  ;;  %v366_v30 = vpop.permute.xlu0 %365  ;;  %v906_v39 = vpop.permute.xlu1 %905  ;;  %v281_v14 = vcombine.high %v171_v8, %v171_v8  ;;  %vm493_vm0 = vcmask 916480  }
  0x89   : > { %195 = vrot.lane.b32.xlu0 %v185_v21, %s1394_s9  ;;  %v367_v34 = vrot.slane %v366_v30, 4  ;;  %v907_v41 = vrot.slane %v906_v39, 4  ;;  %vm1033_vm1 = vcmask 769024  }
  0x8a   : > { %191 = vrot.lane.b32.xlu1 %v184_v24, %s1394_s9  ;;  %v190_v33 = vcombine.high %v184_v24, %v184_v24  ;;  %v810_v45 = vcombine.high %v804_v26, %v804_v26 }
  0x8b   : > { %v373_v38 = vmul.f32 %v367_v34, %v361_v36  ;;  %v369_v44 = vsel %vm368_vm4, %v367_v34, %v366_v30  ;;  %v913_v47 = vmul.f32 %v907_v41, %v901_v43  ;;  %v909_v49 = vsel %vm908_vm5, %v907_v41, %v906_v39  ;;  %v1232_v43 = vld [vmem:[%s1641_s2 + $0x38] sm:$0xff] }
  0x8c   : > { %v474_v46 = vpop.permute.xlu0 %473  ;;  %v372_v48 = vmul.f32 %v1506_v19, %v369_v44  ;;  %v1014_v51 = vpop.permute.xlu1 %1013  ;;  %v912_v52 = vmul.f32 %v909_v49, %v1506_v19 }
  0x8d   : > { %595 = vrot.lane.b32.xlu0 %v588_v27, %s1392_s8  ;;  %v475_v50 = vrot.slane %v474_v46, 4  ;;  %v1015_v56 = vrot.slane %v1014_v51, 4 }
  0x8e   : > { %811 = vrot.lane.b32.xlu1 %v804_v26, %s1395_s10  ;;  %v378_v54 = vcombine.high %v372_v48, %v372_v48  ;;  %v918_v60 = vcombine.high %v912_v52, %v912_v52  ;;  %v172_v26 = vld [vmem:[%s1641_s2] sm:$0xff] }
  0x8f   : > { %v477_v55 = vsel %vm476_vm6, %v475_v50, %v474_v46  ;;  %v481_v57 = vmul.f32 %v475_v50, %v469_v53  ;;  %v1017_v61 = vsel %vm1016_vm7, %v1015_v56, %v1014_v51  ;;  %v1021_v62 = vmul.f32 %v1015_v56, %v1009_v59  ;;  %v1237_v50 = vld [vmem:[%s1641_s2 + $0x40] sm:$0xff] }
  0x90   : > { %v480_v58 = vmul.f32 %v1506_v19, %v477_v55  ;;  %v1020_v63 = vmul.f32 %v1017_v61, %v1506_v19 }
  0x91   : > { %597 = vrot.lane.b32.xlu0 %v594_v29, %s1392_s8  ;;  %s1119_s8 = scalar_lea.sflag [#allocation3], %s161_s27 }
  0x92   : > { %193 = vrot.lane.b32.xlu1 %v190_v33, %s1394_s9  ;;  %v486_v0 = vcombine.high %v480_v58, %v480_v58  ;;  %v1026_v1 = vcombine.high %v1020_v63, %v1020_v63  ;;  %v1227_v33 = vld [vmem:[%s1641_s2 + $0x30] sm:$0xff]  ;;  %s1401_s9 = smov [#allocation2]  }
  0x95   : > { %707 = vrot.lane.b32.xlu0 %v697_v35, %s1396_s11 }
  0x96   : > { %705 = vrot.lane.b32.xlu1 %v702_v37, %s1396_s11 }
  0x99   : > { %703 = vrot.lane.b32.xlu0 %v696_v32, %s1396_s11 }
  0x9a   : > { %383 = vrot.lane.b32.xlu1 %v373_v38, %s1397_s17  ;;  %v1207_v38 = vld [vmem:[%s1641_s2 + $0x10] sm:$0xff] }
  0x9d   : > { %815 = vrot.lane.b32.xlu0 %v805_v42, %s1395_s10 }
  0x9e   : > { %813 = vrot.lane.b32.xlu1 %v810_v45, %s1395_s10  ;;  %s1324_s10 = sshll.u32 %s1401_s9, 4  ;;  %s1325_s10 = int_to_ptr.vmem [resolvable:$false] %s1324_s10 }
  0x9f   : > { %s1326_s11 = scalar_lea.vmem %s1325_s10, 512  ;;  %p1327_p0 = scmp.lt.s32.totalorder %s1599_s4, %s1325_s10 }
  0xa0   : > { %p1328_p1 = scmp.lt.s32.totalorder %s1326_s11, %s1320_s16 }
  0xa1   : > { %379 = vrot.lane.b32.xlu0 %v372_v48, %s1397_s17 }
  0xa2   : > { %923 = vrot.lane.b32.xlu1 %v913_v47, %s1398_s19  ;;  %p1329_p2 = por %p1328_p1, %p1327_p0 }
  0xa4   : > { %p1330_p3 = pnand %p1329_p2, %p1323_p13 }
  0xa5   : > { %381 = vrot.lane.b32.xlu0 %v378_v54, %s1397_s17 }
  0xa6   : > { %919 = vrot.lane.b32.xlu1 %v912_v52, %s1398_s19 }
  0xa9   : > { %921 = vrot.lane.b32.xlu0 %v918_v60, %s1398_s19 }
  0xaa   : > { %491 = vrot.lane.b32.xlu1 %v481_v57, %s1399_s20 }
  0xad   : > { %489 = vrot.lane.b32.xlu0 %v486_v0, %s1399_s20 }
  0xae   : > { %1031 = vrot.lane.b32.xlu1 %v1021_v62, %s1400_s24 }
  0xb1   : > { %1029 = vrot.lane.b32.xlu0 %v1026_v1, %s1400_s24 }
  0xb2   : > { %1027 = vrot.lane.b32.xlu1 %v1020_v63, %s1400_s24 }
  0xb5   : > { %487 = vrot.lane.b32.xlu0 %v480_v58, %s1399_s20 }
  0xf7   : > { %v600_v2 = vpop.permute.xlu1 %599 }
  0xfb   : > { %v196_v3 = vpop.permute.xlu0 %195 }
  0xfc   : > { %v192_v4 = vpop.permute.xlu1 %191 }
  0xff   : > { %v596_v6 = vpop.permute.xlu0 %595 }
 0x100   : > { %v812_v7 = vpop.permute.xlu1 %811 }
 0x103   : > { %v598_v9 = vpop.permute.xlu0 %597 }
 0x104   : > { %v194_v10 = vpop.permute.xlu1 %193  ;;  %v603_v11 = vsel %vm601_vm8, %v598_v9, %v600_v2  ;;  %v602_v12 = vsel %vm601_vm8, %v596_v6, %v598_v9 }
 0x105   : > { %1218 = vmatprep.subr.msk.mxu0 %vm204_vm9, %v603_v11  ;;  %v199_v15 = vsel %vm197_vm10, %v194_v10, %v196_v3  ;;  %v198_v16 = vsel %vm197_vm10, %v192_v4, %v194_v10 }
 0x106   : > { %1200 = vmatprep.subr.msk.mxu1 %vm204_vm9, %v199_v15  ;;  %1219 = vmatpush1.msk.msra.mxu0 %vm204_vm9, %v602_v12 }
 0x107   : > { %1220 = vmatmul.mubr.msk.f32.vlgmr.msra.gmra.mrb[0].mxu0 %vm200_vm11, %v1217_v13  ;;  %v708_v19 = vpop.permute.xlu0 %707  ;;  %1201 = vmatpush1.msk.msra.mxu1 %vm204_vm9, %v198_v16 }
 0x108   : > { %v706_v20 = vpop.permute.xlu1 %705  ;;  %783 = vmatprep.mubr.f32.mxu0 %v1393_v18  ;;  %1202 = vmatmul.mubr.msk.f32.vlgmr.msra.gmra.mrb[0].mxu1 %vm200_vm11, %v1199_v17 }
 0x109   : > { %v711_v21 = vsel %vm709_vm12, %v706_v20, %v708_v19  ;;  %1203 = vmatprep.subr.msk.mxu1 %vm204_vm9, %v281_v14  ;;  %353 = vmatprep.mubr.f32.mxu1 %v1393_v18 }
 0x10a   : > { %1223 = vmatprep.subr.msk.mxu0 %vm204_vm9, %v711_v21  ;;  %1204 = vmatpush1.msk.msra.mxu1 %vm204_vm9, %v171_v8 }
 0x10b   : > { %v704_v22 = vpop.permute.xlu0 %703 }
 0x10c   : > { %v710_v23 = vsel %vm709_vm12, %v704_v22, %v706_v20  ;;  %v384_v24 = vpop.permute.xlu1 %383 }
 0x10d   : > { %1224 = vmatpush1.msk.msra.mxu0 %vm204_vm9, %v710_v23 }
 0x10f   : > { %v816_v27 = vpop.permute.xlu0 %815  ;;  %1225 = vmatmul.mubr.msk.f32.vlgmr.msra.gmra.mrb[0].mxu0 %vm200_vm11, %v1222_v25 }
 0x110   : > { %v814_v28 = vpop.permute.xlu1 %813  ;;  %891 = vmatprep.mubr.f32.mxu0 %v1393_v18  ;;  %1205 = vmatmul.mubr.msk.f32.vlgmr.msra.gmra.mrb[0].mxu1 %vm200_vm11, %v172_v26 }
 0x111   : > { %v818_v29 = vsel %vm817_vm13, %v812_v7, %v814_v28  ;;  %v819_v30 = vsel %vm817_vm13, %v814_v28, %v816_v27  ;;  %459 = vmatprep.mubr.f32.mxu1 %v1393_v18 }
 0x112   : > { %1228 = vmatprep.subr.msk.mxu0 %vm204_vm9, %v819_v30 }
 0x113   : > { %v380_v31 = vpop.permute.xlu0 %379  ;;  %1229 = vmatpush1.msk.msra.mxu0 %vm204_vm9, %v818_v29 }
 0x114   : > { %v924_v32 = vpop.permute.xlu1 %923 }
 0x117   : > { %v382_v34 = vpop.permute.xlu0 %381  ;;  %1230 = vmatmul.mubr.msk.f32.vlgmr.msra.gmra.mrb[0].mxu0 %vm200_vm11, %v1227_v33 }
 0x118   : > { %v386_v35 = vsel %vm385_vm14, %v380_v31, %v382_v34  ;;  %v387_v36 = vsel %vm385_vm14, %v382_v34, %v384_v24  ;;  %v920_v37 = vpop.permute.xlu1 %919  ;;  %999 = vmatprep.mubr.f32.mxu0 %v1393_v18 }
 0x119   : > { %1208 = vmatprep.subr.msk.mxu1 %vm204_vm9, %v387_v36 }
 0x11a   : > { %1209 = vmatpush1.msk.msra.mxu1 %vm204_vm9, %v386_v35 }
 0x11b   : > { %v922_v39 = vpop.permute.xlu0 %921  ;;  %1210 = vmatmul.mubr.msk.f32.vlgmr.msra.gmra.mrb[0].mxu1 %vm200_vm11, %v1207_v38 }
 0x11c   : > { %v926_v40 = vsel %vm925_vm15, %v920_v37, %v922_v39  ;;  %v927_v41 = vsel %vm925_vm15, %v922_v39, %v924_v32  ;;  %v492_v42 = vpop.permute.xlu1 %491  ;;  %567 = vmatprep.mubr.f32.mxu1 %v1393_v18 }
 0x11d   : > { %1233 = vmatprep.subr.msk.mxu0 %vm204_vm9, %v927_v41 }
 0x11e   : > { %1234 = vmatpush1.msk.msra.mxu0 %vm204_vm9, %v926_v40 }
 0x11f   : > { %v490_v44 = vpop.permute.xlu0 %489  ;;  %1235 = vmatmul.mubr.msk.f32.vlgmr.msra.gmra.mrb[0].mxu0 %vm200_vm11, %v1232_v43 }
 0x120   : > { %v495_v45 = vsel %vm493_vm0, %v490_v44, %v492_v42  ;;  %v1032_v46 = vpop.permute.xlu1 %1031  ;;  %1107 = vmatprep.mubr.f32.mxu0 %v1393_v18  ;;  %v1212_v18 = vld [vmem:[%s1641_s2 + $0x18] sm:$0xff] }
 0x121   : > { %1213 = vmatprep.subr.msk.mxu1 %vm204_vm9, %v495_v45 }
 0x123   : > { %v1030_v47 = vpop.permute.xlu0 %1029 }
 0x124   : > { %v1035_v48 = vsel %vm1033_vm1, %v1030_v47, %v1032_v46  ;;  %v1028_v49 = vpop.permute.xlu1 %1027 }
 0x125   : > { %v1034_v51 = vsel %vm1033_vm1, %v1028_v49, %v1030_v47  ;;  %1238 = vmatprep.subr.msk.mxu0 %vm204_vm9, %v1035_v48 }
 0x126   : > { %1239 = vmatpush1.msk.msra.mxu0 %vm204_vm9, %v1034_v51 }
 0x127   : > { %v488_v52 = vpop.permute.xlu0 %487  ;;  %1240 = vmatmul.mubr.msk.f32.vlgmr.msra.gmra.mrb[0].mxu0 %vm200_vm11, %v1237_v50 }
 0x128   : > { %v494_v53 = vsel %vm493_vm0, %v488_v52, %v490_v44 }
 0x129   : > { %1214 = vmatpush1.msk.msra.mxu1 %vm204_vm9, %v494_v53 }
 0x12a   : > { %1215 = vmatmul.mubr.msk.f32.vlgmr.msra.gmra.mrb[0].mxu1 %vm200_vm11, %v1212_v18 }
 0x1fa   : > { %v1109_v54 = vpop.f32.mrb[0].mxu0 }
 0x1fb   : > { %v1111_v55 = vpop.f32.mrb[1].mxu0 }
 0x1fd   : > { %v569_v56 = vpop.f32.mrb[0].mxu1 }
 0x1fe   : > { %v1247_v57 = vadd.f32 %v1109_v54, %v569_v56  ;;  %v571_v58 = vpop.f32.mrb[1].mxu1 }
 0x1ff   : > { %v1248_v59 = vadd.f32 %v1111_v55, %v571_v58 }
 0x200   : > { %1116 = vst [vmem:[%s163_s30] sm:$0xff] %v1247_v57 }
 0x201   : > { %1117 = vst [vmem:[%s163_s30 + $0x8] sm:$0xff] %v1248_v59 }
 0x202   : > { %1333 = shalt.err (!%p1330_p3)
}
 0x203   : > { %s1334_s17 = scalar_lea.hbm %s1597_s7, 256  ;;  %s1338_s24 = scalar_lea.hbm %s1642_s3, 512 }
 0x204   : > { %p1335_p4 = scmp.ne.s32.totalorder %s1597_s7, %s1334_s17  ;;  %p1339_p9 = scmp.lt.u32.totalorder %s1597_s7, %s1642_s3 }
 0x205   : > { %p1340_p10 = scmp.lt.u32.totalorder %s1338_s24, %s1334_s17  ;;  %p1342_p12 = scmp.lt.u32.totalorder %s1334_s17, %s1597_s7 }
 0x206   : > { %p1336_p7 = pnand %p1335_p4, %p1460_p5 }
 0x207   : > { %p1341_p11 = por %p1340_p10, %p1339_p9 }
 0x208   : > { %p1337_p8 = pneg %p1336_p7 }
 0x209   : > { %p1343_p13 = por %p1342_p12, %p1341_p11 }
 0x20b   : > { %p1344_p0 = pnand %p1343_p13, %p1337_p8 }
 0x20d   : > { %1347 = shalt.err (!%p1344_p0)
}
 0x20e   : > { %1264 = dma.vmem_to_hbm [thread:$0]  (%p1460_p5), %s1599_s4, 256, %s1597_s7, %s1119_s8  }
 0x20f PF: > { %p1270_p1 = scmp.ge.s32.totalorder %s1382_s15, 2  ;;  %s1145_s27 = sand.u32 1, %s1370_s12  }
 0x210   : > { %s1146_s28 = scalar_lea.sflag [#allocation3], %s1145_s27 }
 0x211   : > { %p1267_p2 = pnand %p1270_p1, %p1464_p6 }
 0x213   : > { %1365 = dma.done.wait (!%p1267_p2), %s1146_s28, 256  }
 0x214   : > { %1367 = vsyncadd (!%p1267_p2), %s1146_s28, 4294967040  ;;  %p13_p3 = scmp.ge.s32.totalorder %s1447_s18, 4   ;;  %s1645_s12 = smov %s1374_s13 }
 0x215   : > { %s1646_s13 = smov %s1378_s14  ;;  %s1647_s14 = smov %s1458_s21 }
 0x216   : > { %s1648_s15 = smov %s1447_s18  ;;  %15 = sbr.rel (!%p13_p3) target bundleno = 3 (0x3), region = 83 }
 0x21d   :  { %1151 = vsyncpa [#allocation3], 1 }
 0x21e   :  { %1153 = vsyncpa [#allocation3 + $0x1], 1 }

</bundles_post_ra>
